<compile_context>
chip_gen: v7x
topology: tpu7x:2x2x1
jax: 0.10.0
libtpu: 0.0.40
codegen_flags: <defaults>
</compile_context>

<pallas_src>
import functools
import math

import numpy as np
import jax
import jax.numpy as jnp
from jax import lax
from jax.experimental import pallas as pl
from jax.experimental.pallas import tpu as pltpu

_MB = 1024 * 1024


def _round_up(x, m):
    return (x + m - 1) // m * m


def _tpu_generation():
    """Best-effort TPU generation tag ('v5' / 'v6' / 'v7' / None)."""
    try:
        dev = jax.devices()[0]
        if dev.platform != "tpu":
            return None
        kind = str(getattr(dev, "device_kind", "")).lower()
        for tag in ("v7", "7x", "v6", "v5"):
            if tag in kind:
                return "v7" if tag in ("v7", "7x") else tag
    except Exception:
        pass
    return None


def _gen_params(gen):
    """(working-set budget bytes, vmem_limit_bytes, row-tile cap) per TPU generation."""
    if gen == "v7":
        # v7x: 64 MiB VMEM per TensorCore and 2 TCs each holding their own double
        # buffers -> keep the per-TC working set modest.
        return 14 * _MB, 32 * _MB, 1024
    if gen == "v6":
        # v6e: 128 MiB physical / 32 MiB scoped default -> raise the limit, bigger tiles.
        return 24 * _MB, 64 * _MB, 2048
    if gen == "v5":
        # v5e: 128 MiB physical / 16 MiB scoped default.
        return 12 * _MB, 32 * _MB, 1024
    return 10 * _MB, None, 1024   # unknown / older TPUs: stay conservative


def _bytes_per_row(width, itemsize):
    # 2 double-buffers x (input + output) tiles in the I/O dtype + ~6 f32 temporaries
    # (x, x_hi/x_lo, mean_full/xc, xc^2 hi/lo, inv_full) in the packed path.
    return width * (4 * itemsize + 24)


def _pick_tile_rows(num_rows, width, itemsize, budget_bytes, row_cap):
    """Rows per grid step, sized from the generation-aware VMEM budget."""
    tr = budget_bytes // max(_bytes_per_row(width, itemsize), 1)
    tr = int(max(8, min(tr, row_cap)))
    tr -= tr % 8
    tr = max(tr, 8)
    if tr >= num_rows:
        # Whole problem fits one tile: still use >= 2 grid steps when there is enough
        # work so DMA/compute pipeline and megacore can split rows across cores.
        tr = _round_up(-(-num_rows // 2), 8) if num_rows >= 16 else 8
    return tr


def _even_grid_tile_rows(num_rows, tile_rows):
    """Shrink tile_rows (multiple of 8) until the grid has an even number of steps,
    so the 'parallel' row axis shards evenly across v7x's two TensorCores."""
    while tile_rows > 8 and (-(-num_rows // tile_rows)) % 2 == 1:
        tile_rows -= 8
    return tile_rows


def _split_dot(a, b, terms=2):
    """MXU matmul of f32 `a` against a 0/1 matrix `b`, accurate to ~eps_bf16**terms.

    `b` is exact in bf16.  `a` is decomposed into `terms` bf16-exact pieces, so every
    MXU product is (essentially) exact and only the f32 accumulation rounds.  The MXU
    is otherwise idle in this kernel, so the extra passes are free.
    """
    parts = []
    rem = a
    for _ in range(terms - 1):
        hi = rem.astype(jnp.bfloat16).astype(jnp.float32)
        parts.append(hi)
        rem = rem - hi
    parts.append(rem)
    out = jnp.dot(parts[0], b, preferred_element_type=jnp.float32)
    for p in parts[1:]:
        out = out + jnp.dot(p, b, preferred_element_type=jnp.float32)
    return out


def _ln_kernel_dense(x_ref, w_ref, o_ref, *, c):
    """C already lane-dense (multiple of 128): per-row two-pass LayerNorm (XLU reduce)."""
    x = x_ref[...].astype(jnp.float32)
    w = w_ref[...].astype(jnp.float32)
    inv_c = jnp.float32(1.0 / c)
    mean = jnp.sum(x, axis=-1, keepdims=True) * inv_c
    xc = x - mean
    var = jnp.sum(xc * xc, axis=-1, keepdims=True) * inv_c
    inv = lax.rsqrt(var + jnp.float32(1e-5))           # EUP slot (free)
    o_ref[...] = (x * inv * w).astype(o_ref.dtype)


def _ln_kernel_packed(x_ref, w_ref, s_ref, st_ref, o_ref, *, c):
    """g logical rows packed per kernel row so the lane dim (g*c) is 128-dense.

    Per-segment reductions and the per-segment broadcast back to full width are done
    with 0/1 matmuls on the otherwise-idle MXU; the selector matrices are resident
    inputs (hoisted out of the grid loop).
    """
    x = x_ref[...].astype(jnp.float32)        # (tile_rows, g*c)
    w = w_ref[...].astype(jnp.float32)        # (1, g*c)
    s_mat = s_ref[...]                        # (g*c, g)  0/1
    st_mat = st_ref[...]                      # (g, g*c)  0/1
    inv_c = jnp.float32(1.0 / c)

    mean = _split_dot(x, s_mat, terms=2) * inv_c           # (tile_rows, g)
    mean_full = _split_dot(mean, st_mat, terms=2)          # broadcast back to width
    xc = x - mean_full                                     # two-pass variance
    var = _split_dot(xc * xc, s_mat, terms=2) * inv_c      # (tile_rows, g)
    inv_g = lax.rsqrt(var + jnp.float32(1e-5))
    inv_full = _split_dot(inv_g, st_mat, terms=3)          # ~exact 1/sigma broadcast
    o_ref[...] = (x * inv_full * w).astype(o_ref.dtype)


def biasfree_layernorm(x, weight):
    """BiasFree LayerNorm over the last dim.  x: (..., C); weight: (C,)."""
    orig_shape = x.shape
    c = int(orig_shape[-1])
    assert weight.shape == (c,)

    rows = 1
    for d in orig_shape[:-1]:
        rows *= int(d)
    x2 = x.reshape(rows, c)
    itemsize = jnp.dtype(x.dtype).itemsize

    gen = _tpu_generation()
    budget, vmem_limit, row_cap = _gen_params(gen)

    # Pack g logical rows per kernel row so the lane dim (g*c) is a multiple of 128
    # (lane-dense, unmasked stores).  Fall back only if even an 8-row tile of the
    # packed width would blow the VMEM budget.
    g = 128 // math.gcd(c, 128)
    if g > 1 and _bytes_per_row(g * c, itemsize) * 8 > budget:
        g = 1   # TODO(synk): huge odd C falls back to masked stores; could pad C in-block.
    width = g * c

    # Tiny pad (< 8*g rows) only when needed for the packing reshape / the minimum of 8
    # packed rows.  The row-tile remainder is handled by Pallas' partial trailing block
    # instead of a full-tensor pad + slice round trip through HBM.
    packed_rows = -(-rows // g)
    pad_packed = max(8 - packed_rows, 0)
    pad_rows = packed_rows * g - rows + pad_packed * g
    packed_rows += pad_packed
    if pad_rows:
        x2 = jnp.pad(x2, ((0, pad_rows), (0, 0)))
    xp = x2.reshape(packed_rows, width)                       # free row-major reshape
    wp = (jnp.tile(weight, g) if g > 1 else weight).reshape(1, width)

    tile_rows = _pick_tile_rows(packed_rows, width, itemsize, budget, row_cap)
    if gen == "v7":
        tile_rows = _even_grid_tile_rows(packed_rows, tile_rows)
    grid = -(-packed_rows // tile_rows)

    in_specs = [
        pl.BlockSpec((tile_rows, width), lambda i: (i, 0)),
        pl.BlockSpec((1, width), lambda i: (0, 0)),           # weight stays resident
    ]
    args = [xp, wp]
    if g > 1:
        # Compile-time-constant 0/1 segment selectors, built once on the host and
        # passed as resident inputs (constant index_map) -> no per-step rebuild.
        seg = np.repeat(np.arange(g), c)
        s_mat = (seg[:, None] == np.arange(g)[None, :]).astype(np.float32)  # (width, g)
        st_mat = np.ascontiguousarray(s_mat.T)                              # (g, width)
        in_specs += [
            pl.BlockSpec((width, g), lambda i: (0, 0)),
            pl.BlockSpec((g, width), lambda i: (0, 0)),
        ]
        args += [jnp.asarray(s_mat), jnp.asarray(st_mat)]
        kernel = functools.partial(_ln_kernel_packed, c=c)
    else:
        kernel = functools.partial(_ln_kernel_dense, c=c)

    out = pl.pallas_call(
        kernel,
        out_shape=jax.ShapeDtypeStruct((packed_rows, width), x.dtype),
        grid_spec=pltpu.PrefetchScalarGridSpec(
            num_scalar_prefetch=0,
            grid=(grid,),
            in_specs=in_specs,
            out_specs=pl.BlockSpec((tile_rows, width), lambda i: (i, 0)),
        ),
        compiler_params=pltpu.CompilerParams(
            dimension_semantics=("parallel",),                 # rows are independent
            vmem_limit_bytes=vmem_limit,
        ),
        cost_estimate=pl.CostEstimate(
            flops=10 * rows * c,
            transcendentals=rows,
            bytes_accessed=2 * rows * c * itemsize
            + c * jnp.dtype(weight.dtype).itemsize,
        ),
    )(*args)

    out = out.reshape(packed_rows * g, c)
    if pad_rows:
        out = out[:rows]
    return out.reshape(orig_shape)


def _reference(x, weight):
    xf = x.astype(jnp.float32)
    var = jnp.var(xf, axis=-1, keepdims=True)   # ddof=0 == torch unbiased=False
    y = xf / jnp.sqrt(var + 1e-5) * weight.astype(jnp.float32)
    return y.astype(x.dtype)


if __name__ == "__main__":
    key = jax.random.PRNGKey(0)
    kx, kw, kx2 = jax.random.split(key, 3)

    # Typical IHRUT/Restormer use: tokens (B, H*W, C) with small C.
    # C=48 is not a multiple of 128 -> exercises the lane-dense packed path (g=8).
    B, N, C = 2, 64, 48
    x = jax.random.normal(kx, (B, N, C), dtype=jnp.float32)
    # Module init is ones; use a perturbed weight so the scale is actually tested.
    weight = 1.0 + 0.1 * jax.random.normal(kw, (C,), dtype=jnp.float32)

    out = jax.block_until_ready(biasfree_layernorm(x, weight))
    ref = _reference(x, weight)
    assert out.shape == x.shape and out.dtype == x.dtype
    err = float(jnp.max(jnp.abs(out - ref)))
    assert jnp.allclose(out, ref, atol=5e-5, rtol=5e-5), (
        "packed-path mismatch, max abs err = %e" % err)

    # C that is a multiple of 128 exercises the dense per-row path (g == 1) with a row
    # count that does not divide the tile, so the partial trailing block is tested too.
    x2 = jax.random.normal(kx2, (2, 36, 128), dtype=jnp.float32)
    w2 = jnp.ones((128,), dtype=jnp.float32)     # module init: weight = ones
    out2 = jax.block_until_ready(biasfree_layernorm(x2, w2))
    ref2 = _reference(x2, w2)
    assert jnp.allclose(out2, ref2, atol=5e-5, rtol=5e-5), "dense-path mismatch"

    print("KERNEL_OK")
</pallas_src>

<mosaic_0001>
module attributes {stable_mosaic.version = 11 : i64} {
  func.func @_ln_kernel_packed(%arg0: i32, %arg1: memref<8x384xf32, #tpu.memory_space<vmem>>, %arg2: memref<1x384xf32, #tpu.memory_space<vmem>>, %arg3: memref<384x8xf32, #tpu.memory_space<vmem>>, %arg4: memref<8x384xf32, #tpu.memory_space<vmem>>, %arg5: memref<8x384xf32, #tpu.memory_space<vmem>>) attributes {dimension_semantics = [#tpu.dimension_semantics<parallel>], iteration_bounds = array<i64: 2>, scalar_prefetch = 0 : i64, scratch_operands = 0 : i64, tpu.core_type = #tpu.core_type<tc>, window_params = [{transform_indices = @transform_0, window_bounds = array<i64: 8, 384>}, {pipeline_mode = #tpu.pipeline_mode<synchronous>, transform_indices = @transform_1, window_bounds = array<i64: 1, 384>}, {pipeline_mode = #tpu.pipeline_mode<synchronous>, transform_indices = @transform_2, window_bounds = array<i64: 384, 8>}, {pipeline_mode = #tpu.pipeline_mode<synchronous>, transform_indices = @transform_3, window_bounds = array<i64: 8, 384>}, {transform_indices = @transform_4, window_bounds = array<i64: 8, 384>}]} {
    %c0 = arith.constant 0 : index
    %c0_0 = arith.constant 0 : index
    %0 = vector.load %arg1[%c0, %c0_0] : memref<8x384xf32, #tpu.memory_space<vmem>>, vector<8x384xf32>
    %c0_1 = arith.constant 0 : index
    %c0_2 = arith.constant 0 : index
    %1 = vector.load %arg2[%c0_1, %c0_2] : memref<1x384xf32, #tpu.memory_space<vmem>>, vector<1x384xf32>
    %c0_3 = arith.constant 0 : index
    %c0_4 = arith.constant 0 : index
    %2 = vector.load %arg3[%c0_3, %c0_4] : memref<384x8xf32, #tpu.memory_space<vmem>>, vector<384x8xf32>
    %c0_5 = arith.constant 0 : index
    %c0_6 = arith.constant 0 : index
    %3 = vector.load %arg4[%c0_5, %c0_6] : memref<8x384xf32, #tpu.memory_space<vmem>>, vector<8x384xf32>
    %4 = arith.truncf %0 : vector<8x384xf32> to vector<8x384xbf16>
    %5 = arith.extf %4 : vector<8x384xbf16> to vector<8x384xf32>
    %6 = arith.subf %0, %5 : vector<8x384xf32>
    %cst = arith.constant dense<0.000000e+00> : vector<8x8xf32>
    %7 = tpu.matmul %5, %2, %cst {dimension_numbers = #tpu.dot_dimension_numbers<[1], [0], [0], [1], [0, 0, 1, 1], [], []>} : vector<8x384xf32>, vector<384x8xf32>, vector<8x8xf32> -> vector<8x8xf32>
    %cst_7 = arith.constant dense<0.000000e+00> : vector<8x8xf32>
    %8 = tpu.matmul %6, %2, %cst_7 {dimension_numbers = #tpu.dot_dimension_numbers<[1], [0], [0], [1], [0, 0, 1, 1], [], []>} : vector<8x384xf32>, vector<384x8xf32>, vector<8x8xf32> -> vector<8x8xf32>
    %9 = arith.addf %7, %8 : vector<8x8xf32>
    %cst_8 = arith.constant 0.020833334 : f32
    %10 = vector.broadcast %cst_8 : f32 to vector<8x8xf32>
    %11 = arith.mulf %9, %10 : vector<8x8xf32>
    %12 = arith.truncf %11 : vector<8x8xf32> to vector<8x8xbf16>
    %13 = arith.extf %12 : vector<8x8xbf16> to vector<8x8xf32>
    %14 = arith.subf %11, %13 : vector<8x8xf32>
    %cst_9 = arith.constant dense<0.000000e+00> : vector<8x384xf32>
    %15 = tpu.matmul %13, %3, %cst_9 {dimension_numbers = #tpu.dot_dimension_numbers<[1], [0], [0], [1], [0, 0, 1, 1], [], []>} : vector<8x8xf32>, vector<8x384xf32>, vector<8x384xf32> -> vector<8x384xf32>
    %cst_10 = arith.constant dense<0.000000e+00> : vector<8x384xf32>
    %16 = tpu.matmul %14, %3, %cst_10 {dimension_numbers = #tpu.dot_dimension_numbers<[1], [0], [0], [1], [0, 0, 1, 1], [], []>} : vector<8x8xf32>, vector<8x384xf32>, vector<8x384xf32> -> vector<8x384xf32>
    %17 = arith.addf %15, %16 : vector<8x384xf32>
    %18 = arith.subf %0, %17 : vector<8x384xf32>
    %19 = arith.mulf %18, %18 : vector<8x384xf32>
    %20 = arith.truncf %19 : vector<8x384xf32> to vector<8x384xbf16>
    %21 = arith.extf %20 : vector<8x384xbf16> to vector<8x384xf32>
    %22 = arith.subf %19, %21 : vector<8x384xf32>
    %cst_11 = arith.constant dense<0.000000e+00> : vector<8x8xf32>
    %23 = tpu.matmul %21, %2, %cst_11 {dimension_numbers = #tpu.dot_dimension_numbers<[1], [0], [0], [1], [0, 0, 1, 1], [], []>} : vector<8x384xf32>, vector<384x8xf32>, vector<8x8xf32> -> vector<8x8xf32>
    %cst_12 = arith.constant dense<0.000000e+00> : vector<8x8xf32>
    %24 = tpu.matmul %22, %2, %cst_12 {dimension_numbers = #tpu.dot_dimension_numbers<[1], [0], [0], [1], [0, 0, 1, 1], [], []>} : vector<8x384xf32>, vector<384x8xf32>, vector<8x8xf32> -> vector<8x8xf32>
    %25 = arith.addf %23, %24 : vector<8x8xf32>
    %cst_13 = arith.constant 0.020833334 : f32
    %26 = vector.broadcast %cst_13 : f32 to vector<8x8xf32>
    %27 = arith.mulf %25, %26 : vector<8x8xf32>
    %cst_14 = arith.constant 9.99999974E-6 : f32
    %28 = vector.broadcast %cst_14 : f32 to vector<8x8xf32>
    %29 = arith.addf %27, %28 : vector<8x8xf32>
    %30 = math.rsqrt %29 : vector<8x8xf32>
    %31 = arith.truncf %30 : vector<8x8xf32> to vector<8x8xbf16>
    %32 = arith.extf %31 : vector<8x8xbf16> to vector<8x8xf32>
    %33 = arith.subf %30, %32 : vector<8x8xf32>
    %34 = arith.truncf %33 : vector<8x8xf32> to vector<8x8xbf16>
    %35 = arith.extf %34 : vector<8x8xbf16> to vector<8x8xf32>
    %36 = arith.subf %33, %35 : vector<8x8xf32>
    %cst_15 = arith.constant dense<0.000000e+00> : vector<8x384xf32>
    %37 = tpu.matmul %32, %3, %cst_15 {dimension_numbers = #tpu.dot_dimension_numbers<[1], [0], [0], [1], [0, 0, 1, 1], [], []>} : vector<8x8xf32>, vector<8x384xf32>, vector<8x384xf32> -> vector<8x384xf32>
    %cst_16 = arith.constant dense<0.000000e+00> : vector<8x384xf32>
    %38 = tpu.matmul %35, %3, %cst_16 {dimension_numbers = #tpu.dot_dimension_numbers<[1], [0], [0], [1], [0, 0, 1, 1], [], []>} : vector<8x8xf32>, vector<8x384xf32>, vector<8x384xf32> -> vector<8x384xf32>
    %39 = arith.addf %37, %38 : vector<8x384xf32>
    %cst_17 = arith.constant dense<0.000000e+00> : vector<8x384xf32>
    %40 = tpu.matmul %36, %3, %cst_17 {dimension_numbers = #tpu.dot_dimension_numbers<[1], [0], [0], [1], [0, 0, 1, 1], [], []>} : vector<8x8xf32>, vector<8x384xf32>, vector<8x384xf32> -> vector<8x384xf32>
    %41 = arith.addf %39, %40 : vector<8x384xf32>
    %42 = arith.mulf %0, %41 : vector<8x384xf32>
    %43 = vector.broadcast %1 : vector<1x384xf32> to vector<8x384xf32>
    %44 = arith.mulf %42, %43 : vector<8x384xf32>
    %c0_18 = arith.constant 0 : index
    %c0_19 = arith.constant 0 : index
    %45 = vector.load %arg5[%c0_18, %c0_19] : memref<8x384xf32, #tpu.memory_space<vmem>>, vector<8x384xf32>
    tpu.vector_store %arg5[%c0_18, %c0_19], %44 {strides = array<i32>} : memref<8x384xf32, #tpu.memory_space<vmem>>, vector<8x384xf32>,
    return
  }
  func.func @transform_0(%arg0: i32) -> (i32, i32) {
    %c0_i32 = arith.constant 0 : i32
    %c0_i32_0 = arith.constant 0 : i32
    return %arg0, %c0_i32 : i32, i32
  }
  func.func @transform_1(%arg0: i32) -> (i32, i32) {
    %c0_i32 = arith.constant 0 : i32
    %c0_i32_0 = arith.constant 0 : i32
    %c0_i32_1 = arith.constant 0 : i32
    return %c0_i32, %c0_i32_0 : i32, i32
  }
  func.func @transform_2(%arg0: i32) -> (i32, i32) {
    %c0_i32 = arith.constant 0 : i32
    %c0_i32_0 = arith.constant 0 : i32
    %c0_i32_1 = arith.constant 0 : i32
    return %c0_i32, %c0_i32_0 : i32, i32
  }
  func.func @transform_3(%arg0: i32) -> (i32, i32) {
    %c0_i32 = arith.constant 0 : i32
    %c0_i32_0 = arith.constant 0 : i32
    %c0_i32_1 = arith.constant 0 : i32
    return %c0_i32, %c0_i32_0 : i32, i32
  }
  func.func @transform_4(%arg0: i32) -> (i32, i32) {
    %c0_i32 = arith.constant 0 : i32
    %c0_i32_0 = arith.constant 0 : i32
    return %arg0, %c0_i32 : i32, i32
  }
}

</mosaic_0001>

<bundles_post_ra>
// kernel: tpu_custom_call.1
= control target key start
LH: loop header
LB: loop body
LE: loop exit
PB: predicated region body
PF: predicated region fallthrough
CT: control target
= control target key end

     0   :  { %9 = vsyncpa [#allocation3], 0  ;;  %s2973_s0 = inlined_call_operand.vmem [shape: f32[16,384], index: 0, kind: input, shape index: {}]   ;;  %s2974_s1 = inlined_call_operand.vmem [shape: f32[1,384], index: 1, kind: input, shape index: {}]   ;;  %s2975_s2 = inlined_call_operand.vmem [shape: f32[384,8], index: 2, kind: input, shape index: {}]   ;;  %s2976_s3 = inlined_call_operand.vmem [shape: f32[8,384], index: 3, kind: input, shape index: {}]   ;;  %s2977_s4 = inlined_call_operand.hbm [shape: f32[16,384], index: 4, kind: output, shape index: {}]  }
   0x1   :  { %11 = vsyncpa [#allocation3 + $0x1], 0  ;;  %s2456_s15 = smov 0   ;;  %s2458_s16 = smov 0  }
   0x2   :  { %s2460_s17 = smov 0   ;;  %s2462_s18 = smov 0  }
   0x3 LB: > { %s2477_s19 = sadd.s32 4294967295, %s2425_s18   ;;  %s1671_s20 = sadd.s32 4294967294, %s2425_s18   ;;  %s2425_s18 = sphi %s2462_s18, %s2983_s18   ;;  %s2421_s17 = sphi %s2460_s17, %s2982_s17   ;;  %s2417_s16 = sphi %s2458_s16, %s2981_s16   ;;  %s2413_s15 = sphi %s2456_s15, %s2980_s15  }
   0x4   : > { %s2481_s21 = sadd.s32 1, %s2425_s18   ;;  %s113_s22 = sadd.s32 1, %s2421_s17 }
   0x5   : > { %s110_s23 = ssub.s32 %s2425_s18, %s2481_s21  ;;  %p123_p0 = scmp.ne.s32.totalorder %s2421_s17, %s2417_s16 }
   0x6   : > { %p111_p1 = scmp.eq.s32.totalorder %s110_s23, 0  ;;  %p124_p2 = scmp.eq.s32.totalorder %s2477_s19, 1 }
   0x7   : > { %p129_p3 = scmp.ne.s32.totalorder %s2417_s16, %s2413_s15  ;;  %p130_p4 = scmp.eq.s32.totalorder %s1671_s20, 1 }
   0x8   : > { %s2492_s24 = scalar_select %p111_p1, %s2421_s17, %s113_s22  }
   0x9   : > { %p2494_p5 = por %p124_p2, %p123_p0  ;;  %p2498_p6 = por %p130_p4, %p129_p3 }
   0xa   : > { %p1674_p7 = scmp.ge.s32.totalorder %s2425_s18, 1  ;;  %p165_p8 = scmp.lt.s32.totalorder %s2425_s18, 3 }
   0xc   : > { %p166_p9 = pnand %p1674_p7, %p165_p8 }
   0xd   : > { %v216_v0 = vld [vmem:[%s2975_s2 + $0x80] sm:$0xff] (!%p166_p9)  ;;  %v217_v1 = vld [vmem:[%s2975_s2 + $0x88] sm:$0xff] (!%p166_p9)  ;;  %v2427_v3 = vmov (!%p166_p9), 0.0|0.0   ;;  %p191_p10 = scmp.lt.s32.totalorder (!%p166_p9), %s2477_s19, 1  ;;  %v218_v10 = vld [vmem:[%s2975_s2 + $0x90] sm:$0xff] (!%p166_p9)  ;;  %vm2428_vm0 = vmmov (!%p166_p9), 0  }
   0xe   : > { %169 = sbr.rel (%p166_p9) target bundleno = 1063 (0x427), region = 36  ;;  %v232_v2 = vld [vmem:[%s2975_s2 + $0x100] sm:$0xff] (!%p166_p9)  ;;  %2104 = vmatprep.subr.bf16.mxu1 (!%p166_p9), %v2427_v3  ;;  %v2514_v4 = vpack.c.bf16 (!%p166_p9), %v217_v1, %v216_v0  ;;  %v233_v5 = vld [vmem:[%s2975_s2 + $0x108] sm:$0xff] (!%p166_p9)  ;;  %v219_v11 = vld [vmem:[%s2975_s2 + $0x98] sm:$0xff] (!%p166_p9)  ;;  %v2429_v13 = vmov (!%p166_p9), 0.0   ;;  %vm544_vm1 = vcmask (!%p166_p9), 64512  }
   0xf   : > { %v200_v6 = vld [vmem:[%s2975_s2] sm:$0xff] (!%p166_p9)  ;;  %v201_v7 = vld [vmem:[%s2975_s2 + $0x8] sm:$0xff] (!%p166_p9)  ;;  %v2526_v8 = vpack.c.bf16 (!%p166_p9), %v233_v5, %v232_v2  ;;  %v234_v12 = vld [vmem:[%s2975_s2 + $0x110] sm:$0xff] (!%p166_p9)  ;;  %1939 = vmatprep.mubr.msk.f32.mxu1 (!%p166_p9), %vm2428_vm0, %v2429_v13  ;;  %v2542_v14 = vpack.c.bf16 (!%p166_p9), %v219_v11, %v218_v10  ;;  %s2318_s10 = smul.u32 (!%p166_p9), 384, %s2477_s19  ;;  %s2430_s28 = smov (!%p166_p9), [#allocation2]  }
  0x10   : > { %v2528_v9 = vpack.c.bf16 (!%p166_p9), %v201_v7, %v200_v6  ;;  %2073 = vmatprep.subr.bf16.mxu0 (!%p166_p9), %v2514_v4  ;;  %v235_v15 = vld [vmem:[%s2975_s2 + $0x118] sm:$0xff] (!%p166_p9)  ;;  %v202_v16 = vld [vmem:[%s2975_s2 + $0x10] sm:$0xff] (!%p166_p9)  ;;  %v220_v20 = vld [vmem:[%s2975_s2 + $0xa0] sm:$0xff] (!%p166_p9)  ;;  %s2367_s30 = sshll.u32 (!%p166_p9), %s2430_s28, 4  ;;  %s2368_s30 = int_to_ptr.vmem [resolvable:$false] %s2367_s30 }
  0x11   : > { %v203_v17 = vld [vmem:[%s2975_s2 + $0x18] sm:$0xff] (!%p166_p9)  ;;  %2106 = vmatpush3.bf16.msra.mxu1 (!%p166_p9), %v2526_v8  ;;  %v2555_v18 = vpack.c.bf16 (!%p166_p9), %v235_v15, %v234_v12  ;;  %v221_v21 = vld [vmem:[%s2975_s2 + $0xa8] sm:$0xff] (!%p166_p9)  ;;  %v236_v22 = vld [vmem:[%s2975_s2 + $0x120] sm:$0xff] (!%p166_p9)  ;;  %s2931_s23 = scalar_lea.hbm (!%p166_p9), %s2977_s4, %s2318_s10  ;;  %s2369_s5 = scalar_lea.vmem (!%p166_p9), %s2368_s30, 768 }
  0x12   : > { %2075 = vmatpush3.bf16.msra.mxu0 (!%p166_p9), %v2528_v9  ;;  %v2557_v19 = vpack.c.bf16 (!%p166_p9), %v203_v17, %v202_v16  ;;  %2107 = vmatprep.subr.bf16.mxu1 (!%p166_p9), %v2427_v3  ;;  %v2570_v23 = vpack.c.bf16 (!%p166_p9), %v221_v21, %v220_v20  ;;  %v237_v24 = vld [vmem:[%s2975_s2 + $0x128] sm:$0xff] (!%p166_p9)  ;;  %v204_v25 = vld [vmem:[%s2975_s2 + $0x20] sm:$0xff] (!%p166_p9)  ;;  %v222_v27 = vld [vmem:[%s2975_s2 + $0xb0] sm:$0xff] (!%p166_p9) }
  0x13   : > { %2077 = vmatprep.subr.bf16.mxu0 (!%p166_p9), %v2542_v14  ;;  %v205_v26 = vld [vmem:[%s2975_s2 + $0x28] sm:$0xff] (!%p166_p9)  ;;  %v223_v28 = vld [vmem:[%s2975_s2 + $0xb8] sm:$0xff] (!%p166_p9)  ;;  %v2594_v29 = vpack.c.bf16 (!%p166_p9), %v237_v24, %v236_v22  ;;  %v238_v31 = vld [vmem:[%s2975_s2 + $0x130] sm:$0xff] (!%p166_p9) }
  0x14   : > { %v2596_v30 = vpack.c.bf16 (!%p166_p9), %v205_v26, %v204_v25  ;;  %v2603_v32 = vpack.c.bf16 (!%p166_p9), %v223_v28, %v222_v27  ;;  %v239_v33 = vld [vmem:[%s2975_s2 + $0x138] sm:$0xff] (!%p166_p9)  ;;  %v206_v34 = vld [vmem:[%s2975_s2 + $0x30] sm:$0xff] (!%p166_p9)  ;;  %v224_v36 = vld [vmem:[%s2975_s2 + $0xc0] sm:$0xff] (!%p166_p9) }
  0x15   : > { %s2584_s29 = scalar_select %p191_p10, %s2477_s19, 1  ;;  %2109 = vmatpush3.bf16.msra.mxu1 %v2555_v18  ;;  %v207_v35 = vld [vmem:[%s2975_s2 + $0x38] sm:$0xff]  ;;  %v225_v37 = vld [vmem:[%s2975_s2 + $0xc8] sm:$0xff]  ;;  %v2623_v38 = vpack.c.bf16 %v239_v33, %v238_v31  ;;  %v240_v40 = vld [vmem:[%s2975_s2 + $0x140] sm:$0xff] }
  0x16   : > { %2079 = vmatpush3.bf16.msra.mxu0 %v2557_v19  ;;  %2110 = vmatprep.subr.bf16.mxu1 %v2427_v3  ;;  %v2625_v39 = vpack.c.bf16 %v207_v35, %v206_v34  ;;  %v2632_v41 = vpack.c.bf16 %v225_v37, %v224_v36  ;;  %v241_v42 = vld [vmem:[%s2975_s2 + $0x148] sm:$0xff]  ;;  %v208_v43 = vld [vmem:[%s2975_s2 + $0x40] sm:$0xff]  ;;  %v226_v45 = vld [vmem:[%s2975_s2 + $0xd0] sm:$0xff] }
  0x17   : > { %2081 = vmatprep.subr.bf16.mxu0 %v2570_v23  ;;  %s2317_s22 = smul.u32 24, %s2584_s29  ;;  %v209_v44 = vld [vmem:[%s2975_s2 + $0x48] sm:$0xff]  ;;  %v227_v46 = vld [vmem:[%s2975_s2 + $0xd8] sm:$0xff]  ;;  %v2654_v47 = vpack.c.bf16 %v241_v42, %v240_v40  ;;  %v242_v49 = vld [vmem:[%s2975_s2 + $0x150] sm:$0xff]  ;;  %s188_s29 = sand.u32 1, %s2417_s16  }
  0x18   : > { %v2656_v48 = vpack.c.bf16 %v209_v44, %v208_v43  ;;  %v2665_v51 = vpack.c.bf16 %v227_v46, %v226_v45  ;;  %v243_v52 = vld [vmem:[%s2975_s2 + $0x158] sm:$0xff]  ;;  %v210_v53 = vld [vmem:[%s2975_s2 + $0x50] sm:$0xff]  ;;  %v228_v56 = vld [vmem:[%s2975_s2 + $0xe0] sm:$0xff]  ;;  %s2316_s7 = smul.u32 24, %s188_s29  ;;  %s1598_s19 = scalar_lea.sflag [#allocation3], %s188_s29 }
  0x19   : > { %2112 = vmatpush3.bf16.msra.mxu1 %v2594_v29  ;;  %s195_s14 = scalar_lea.vmem %s2973_s0, %s2317_s22  ;;  %v211_v54 = vld [vmem:[%s2975_s2 + $0x58] sm:$0xff]  ;;  %v229_v57 = vld [vmem:[%s2975_s2 + $0xe8] sm:$0xff]  ;;  %v2686_v59 = vpack.c.bf16 %v243_v52, %v242_v49  ;;  %v244_v61 = vld [vmem:[%s2975_s2 + $0x160] sm:$0xff] }
  0x1a   : > { %2083 = vmatpush3.bf16.msra.mxu0 %v2596_v30  ;;  %2113 = vmatprep.subr.bf16.mxu1 %v2427_v3  ;;  %v2661_v50 = vld [vmem:[%s195_s14 + $0x8] sm:$0xff]  ;;  %v2688_v60 = vpack.c.bf16 %v211_v54, %v210_v53  ;;  %v2693_v62 = vld [vmem:[%s195_s14] sm:$0xff]  ;;  %v2695_v63 = vld [vmem:[%s195_s14 + $0x10] sm:$0xff]  ;;  %v2699_v0 = vpack.c.bf16 %v229_v57, %v228_v56  ;;  %s190_s11 = scalar_lea.vmem [#allocation2], %s2316_s7 }
  0x1b   : > { %2085 = vmatprep.subr.bf16.mxu0 %v2603_v32  ;;  %v252_v55 = vpack.c.bf16 %v2661_v50, %v2661_v50  ;;  %v245_v1 = vld [vmem:[%s2975_s2 + $0x168] sm:$0xff]  ;;  %v212_v2 = vld [vmem:[%s2975_s2 + $0x60] sm:$0xff]  ;;  %v230_v7 = vld [vmem:[%s2975_s2 + $0xf0] sm:$0xff]  ;;  %v251_v11 = vpack.c.bf16 %v2693_v62, %v2693_v62  ;;  %v253_v12 = vpack.c.bf16 %v2695_v63, %v2695_v63  ;;  %s1612_s12 = sshll.u32 %s190_s11, 4  ;;  %s2933_s12 = int_to_ptr.vmem [resolvable:$true] %s1612_s12 }
  0x1c   : > { %v213_v5 = vld [vmem:[%s2975_s2 + $0x68] sm:$0xff]  ;;  %v231_v10 = vld [vmem:[%s2975_s2 + $0xf8] sm:$0xff]  ;;  %v2723_v15 = vpack.c.bf16 %v245_v1, %v244_v61  ;;  %v246_v17 = vld [vmem:[%s2975_s2 + $0x170] sm:$0xff]  ;;  %s2363_s27 = scalar_lea.vmem %s2933_s12, 384  ;;  %p2370_p0 = scmp.lt.s32.totalorder %s2933_s12, %s2368_s30 }
  0x1d   : > { %2115 = vmatpush3.bf16.msra.mxu1 %v2623_v38  ;;  %v255_v58 = vunpack.c.l.bf16 %v252_v55  ;;  %v2725_v16 = vpack.c.bf16 %v213_v5, %v212_v2  ;;  %v2732_v20 = vpack.c.bf16 %v231_v10, %v230_v7  ;;  %v247_v21 = vld [vmem:[%s2975_s2 + $0x178] sm:$0xff]  ;;  %v214_v22 = vld [vmem:[%s2975_s2 + $0x70] sm:$0xff]  ;;  %v254_v25 = vunpack.c.l.bf16 %v251_v11  ;;  %v2796_v34 = vld [vmem:[%s2976_s3 + $0x8] sm:$0xff]  ;;  %p2364_p11 = scmp.ne.s32.totalorder %s2933_s12, %s2363_s27  ;;  %p2371_p1 = scmp.lt.s32.totalorder %s2369_s5, %s2363_s27 }
  0x1e   : > { %2087 = vmatpush3.bf16.msra.mxu0 %v2625_v39  ;;  %2116 = vmatprep.subr.bf16.mxu1 %v2427_v3  ;;  %v215_v24 = vld [vmem:[%s2975_s2 + $0x78] sm:$0xff]  ;;  %v256_v26 = vunpack.c.l.bf16 %v253_v12  ;;  %v2745_v27 = vpack.c.bf16 %v247_v21, %v246_v17  ;;  %v2801_v35 = vld [vmem:[%s2976_s3] sm:$0xff]  ;;  %v2806_v36 = vld [vmem:[%s2976_s3 + $0x10] sm:$0xff] }
  0x1f   : > { %2089 = vmatprep.subr.bf16.mxu0 %v2632_v41  ;;  %v258_v6 = vsub.f32 %v2661_v50, %v255_v58  ;;  %v2747_v28 = vpack.c.bf16 %v215_v24, %v214_v22  ;;  %v257_v31 = vsub.f32 %v2693_v62, %v254_v25  ;;  %p2365_p12 = pnand %p2364_p11, %p2494_p5  ;;  %p2372_p2 = por %p2371_p1, %p2370_p0 }
  0x20   : > { %v259_v33 = vsub.f32 %v2695_v63, %v256_v26 }
  0x21   : > { %2118 = vmatpush3.bf16.msra.mxu1 %v2654_v47  ;;  %324 = vmatprep.mubr.f32.mxu0 %v258_v6  ;;  %p2366_p13 = pneg %p2365_p12 }
  0x22   : > { %2091 = vmatpush3.bf16.msra.mxu0 %v2656_v48  ;;  %2119 = vmatprep.subr.bf16.mxu1 %v2427_v3 }
  0x23   : > { %2093 = vmatprep.subr.bf16.mxu0 %v2665_v51  ;;  %p2373_p3 = pnand %p2372_p2, %p2366_p13 }
  0x25   : > { %2121 = vmatpush3.bf16.msra.mxu1 %v2686_v59 }
  0x26   : > { %2095 = vmatpush3.bf16.msra.mxu0 %v2688_v60  ;;  %2122 = vmatprep.subr.bf16.mxu1 %v2427_v3 }
  0x27   : > { %2097 = vmatprep.subr.bf16.mxu0 %v2699_v0 }
  0x29   : > { %2124 = vmatpush3.bf16.msra.mxu1 %v2723_v15 }
  0x2a   : > { %2099 = vmatpush3.bf16.msra.mxu0 %v2725_v16  ;;  %2125 = vmatprep.subr.bf16.mxu1 %v2427_v3 }
  0x2b   : > { %2101 = vmatprep.subr.bf16.mxu0 %v2732_v20 }
  0x2d   : > { %2127 = vmatpush3.bf16.msra.mxu1 %v2745_v27 }
  0x2e   : > { %2103 = vmatpush3.bf16.msra.mxu0 %v2747_v28  ;;  %2160 = vmatprep.subr.bf16.mxu1 %v2427_v3 }
  0x2f   : > { %2129 = vmatprep.subr.bf16.mxu0 %v2514_v4 }
  0x30   : > { %1940 = vmatmul.mubr.f32.vlgmr.msra.gmra.mrb[0].mxu1 %v259_v33 }
  0x31   : > { %325 = vmatmul.mubr.f32.vlgmr.msra.gmra.mrb[0].mxu0 %v257_v31  ;;  %2162 = vmatpush3.bf16.msra.mxu1 %v2526_v8 }
  0x32   : > { %2131 = vmatpush3.bf16.msra.mxu0 %v2528_v9  ;;  %2163 = vmatprep.subr.bf16.mxu1 %v2427_v3 }
  0x33   : > { %2133 = vmatprep.subr.bf16.mxu0 %v2542_v14  ;;  %1974 = vmatprep.mubr.msk.f32.mxu1 %vm2428_vm0, %v2429_v13 }
  0x34   : > { %464 = vmatprep.mubr.f32.mxu0 %v255_v58 }
  0x35   : > { %2165 = vmatpush3.bf16.msra.mxu1 %v2555_v18 }
  0x36   : > { %2135 = vmatpush3.bf16.msra.mxu0 %v2557_v19  ;;  %2166 = vmatprep.subr.bf16.mxu1 %v2427_v3 }
  0x37   : > { %2137 = vmatprep.subr.bf16.mxu0 %v2570_v23 }
  0x39   : > { %2168 = vmatpush3.bf16.msra.mxu1 %v2594_v29 }
  0x3a   : > { %2139 = vmatpush3.bf16.msra.mxu0 %v2596_v30  ;;  %2169 = vmatprep.subr.bf16.mxu1 %v2427_v3 }
  0x3b   : > { %2141 = vmatprep.subr.bf16.mxu0 %v2603_v32 }
  0x3d   : > { %2171 = vmatpush3.bf16.msra.mxu1 %v2623_v38 }
  0x3e   : > { %2143 = vmatpush3.bf16.msra.mxu0 %v2625_v39  ;;  %2172 = vmatprep.subr.bf16.mxu1 %v2427_v3 }
  0x3f   : > { %2145 = vmatprep.subr.bf16.mxu0 %v2632_v41 }
  0x41   : > { %2174 = vmatpush3.bf16.msra.mxu1 %v2654_v47 }
  0x42   : > { %2147 = vmatpush3.bf16.msra.mxu0 %v2656_v48  ;;  %2175 = vmatprep.subr.bf16.mxu1 %v2427_v3 }
  0x43   : > { %2149 = vmatprep.subr.bf16.mxu0 %v2665_v51 }
  0x45   : > { %2177 = vmatpush3.bf16.msra.mxu1 %v2686_v59 }
  0x46   : > { %2151 = vmatpush3.bf16.msra.mxu0 %v2688_v60  ;;  %2178 = vmatprep.subr.bf16.mxu1 %v2427_v3 }
  0x47   : > { %2153 = vmatprep.subr.bf16.mxu0 %v2699_v0 }
  0x49   : > { %2180 = vmatpush3.bf16.msra.mxu1 %v2723_v15 }
  0x4a   : > { %2155 = vmatpush3.bf16.msra.mxu0 %v2725_v16  ;;  %2181 = vmatprep.subr.bf16.mxu1 %v2427_v3 }
  0x4b   : > { %2157 = vmatprep.subr.bf16.mxu0 %v2732_v20 }
  0x4d   : > { %2183 = vmatpush3.bf16.msra.mxu1 %v2745_v27 }
  0x4e   : > { %2159 = vmatpush3.bf16.msra.mxu0 %v2747_v28  ;;  %1977 = vmatprep.subr.mxu1 %v2429_v13 }
  0x4f   : > { %548 = vmatprep.subr.mxu0 %v2796_v34 }
  0x50   : > { %1975 = vmatmul.mubr.f32.vlgmr.msra.gmra.mrb[0].mxu1 %v256_v26 }
  0x51   : > { %465 = vmatmul.mubr.f32.vlgmr.msra.gmra.mrb[2].mxu0 %v254_v25  ;;  %1979 = vmatprep.mubr.msk.f32.mxu1 %vm2428_vm0, %v2429_v13 }
  0x52   : > { %612 = vmatprep.mubr.f32.mxu0 %v2429_v13  ;;  %1978 = vmatpush3.msra.mxu1 %v2806_v36 }
  0x53   : > { %549 = vmatpush1.msra.mxu0 %v2801_v35  ;;  %1982 = vmatprep.subr.mxu1 %v2429_v13 }
  0x54   : > { %692 = vmatprep.subr.mxu0 %v2796_v34 }
 0x104   : > { %v1721_v37 = vpop.f32.mrb[0].mxu0 }
 0x105   : > { %v1722_v40 = vpop.f32.mrb[1].mxu0 }
 0x106   : > { %v1723_v42 = vadd.f32 %v1722_v40, %v1721_v37 }
 0x123   : > { %v536_v43 = vpop.f32.mrb[0].mxu1 }
 0x124   : > { %v1773_v44 = vpop.f32.mrb[2].mxu0  ;;  %v1976_v45 = vpop.f32.mrb[1].mxu1 }
 0x125   : > { %v1774_v46 = vpop.f32.mrb[3].mxu0 }
 0x126   : > { %v1775_v49 = vadd.f32 %v1774_v46, %v1773_v44 }
 0x128   : > { %v2296_v52 = vadd.f32 %v1775_v49, %v1723_v42 }
 0x12a   : > { %v2297_v53 = vadd.f32 %v2296_v52, %v536_v43 }
 0x12c   : > { %v540_v54 = vmul.f32 0.020833334, %v2297_v53 }
 0x12e   : > { %v541_v55 = vpack.c.bf16 %v540_v54, %v540_v54 }
 0x130   : > { %v542_v56 = vunpack.c.l.bf16 %v541_v55 }
 0x132   : > { %v543_v57 = vsub.f32 %v540_v54, %v542_v56 }
 0x134   : > { %1676 = vmatmul.mubr.msk.f32.vlgmr.msra.gmra.mrb[4].mxu0 %vm544_vm1, %v543_v57  ;;  %1980 = vmatmul.mubr.msk.f32.vlgmr.msra.gmra.mrb[2].mxu1 %vm544_vm1, %v543_v57 }
 0x135   : > { %693 = vmatpush1.msra.mxu0 %v2801_v35  ;;  %756 = vmatprep.mubr.f32.mxu0 %v2429_v13 }
 0x136   : > { %1983 = vmatpush3.msra.mxu1 %v2806_v36  ;;  %1984 = vmatprep.mubr.msk.f32.mxu1 %vm2428_vm0, %v2429_v13 }
 0x137   : > { %2216 = vmatprep.subr.bf16.mxu1 %v2427_v3  ;;  %2185 = vmatprep.subr.bf16.mxu0 %v2514_v4 }
 0x13c   : > { %1678 = vmatmul.mubr.msk.f32.vlgmr.msra.gmra.mrb[4].mxu0 %vm544_vm1, %v542_v56  ;;  %1985 = vmatmul.mubr.msk.f32.vlgmr.msra.gmra.mrb[2].mxu1 %vm544_vm1, %v542_v56 }
 0x13d   : > { %2218 = vmatpush3.bf16.msra.mxu1 %v2526_v8  ;;  %2187 = vmatpush3.bf16.msra.mxu0 %v2528_v9 }
 0x13e   : > { %2219 = vmatprep.subr.bf16.mxu1 %v2427_v3  ;;  %2189 = vmatprep.subr.bf16.mxu0 %v2542_v14 }
 0x13f   : > { %2019 = vmatprep.mubr.msk.f32.mxu1 %vm2428_vm0, %v2429_v13 }
 0x141   : > { %2221 = vmatpush3.bf16.msra.mxu1 %v2555_v18  ;;  %2191 = vmatpush3.bf16.msra.mxu0 %v2557_v19 }
 0x142   : > { %2222 = vmatprep.subr.bf16.mxu1 %v2427_v3  ;;  %2193 = vmatprep.subr.bf16.mxu0 %v2570_v23 }
 0x145   : > { %2224 = vmatpush3.bf16.msra.mxu1 %v2594_v29  ;;  %2195 = vmatpush3.bf16.msra.mxu0 %v2596_v30 }
 0x146   : > { %2225 = vmatprep.subr.bf16.mxu1 %v2427_v3  ;;  %2197 = vmatprep.subr.bf16.mxu0 %v2603_v32 }
 0x149   : > { %2227 = vmatpush3.bf16.msra.mxu1 %v2623_v38  ;;  %2199 = vmatpush3.bf16.msra.mxu0 %v2625_v39 }
 0x14a   : > { %2228 = vmatprep.subr.bf16.mxu1 %v2427_v3  ;;  %2201 = vmatprep.subr.bf16.mxu0 %v2632_v41 }
 0x14d   : > { %2230 = vmatpush3.bf16.msra.mxu1 %v2654_v47  ;;  %2203 = vmatpush3.bf16.msra.mxu0 %v2656_v48 }
 0x14e   : > { %2231 = vmatprep.subr.bf16.mxu1 %v2427_v3  ;;  %2205 = vmatprep.subr.bf16.mxu0 %v2665_v51 }
 0x151   : > { %2233 = vmatpush3.bf16.msra.mxu1 %v2686_v59  ;;  %2207 = vmatpush3.bf16.msra.mxu0 %v2688_v60 }
 0x152   : > { %2234 = vmatprep.subr.bf16.mxu1 %v2427_v3  ;;  %2209 = vmatprep.subr.bf16.mxu0 %v2699_v0 }
 0x155   : > { %2236 = vmatpush3.bf16.msra.mxu1 %v2723_v15  ;;  %2211 = vmatpush3.bf16.msra.mxu0 %v2725_v16 }
 0x156   : > { %2237 = vmatprep.subr.bf16.mxu1 %v2427_v3  ;;  %2213 = vmatprep.subr.bf16.mxu0 %v2732_v20 }
 0x159   : > { %2239 = vmatpush3.bf16.msra.mxu1 %v2745_v27  ;;  %2215 = vmatpush3.bf16.msra.mxu0 %v2747_v28 }
 0x15a   : > { %2272 = vmatprep.subr.bf16.mxu1 %v2427_v3  ;;  %2241 = vmatprep.subr.bf16.mxu0 %v2514_v4 }
 0x20f   : > { %v758_v58 = vpop.f32.mrb[4].mxu0  ;;  %v829_v61 = vpop.f32.mrb[2].mxu1 }
 0x210   : > { %v833_v1 = vsub.f32 %v2693_v62, %v758_v58  ;;  %v835_v2 = vsub.f32 %v2695_v63, %v829_v61  ;;  %v760_v5 = vpop.f32.mrb[5].mxu0  ;;  %v1986_v6 = vpop.f32.mrb[3].mxu1 }
 0x211   : > { %v834_v7 = vsub.f32 %v2661_v50, %v760_v5 }
 0x212   : > { %v836_v10 = vmul.f32 %v833_v1, %v833_v1  ;;  %v838_v11 = vmul.f32 %v835_v2, %v835_v2 }
 0x213   : > { %v837_v12 = vmul.f32 %v834_v7, %v834_v7 }
 0x214   : > { %v839_v17 = vpack.c.bf16 %v836_v10, %v836_v10  ;;  %v841_v21 = vpack.c.bf16 %v838_v11, %v838_v11 }
 0x215   : > { %v840_v22 = vpack.c.bf16 %v837_v12, %v837_v12 }
 0x216   : > { %v842_v24 = vunpack.c.l.bf16 %v839_v17  ;;  %v844_v25 = vunpack.c.l.bf16 %v841_v21 }
 0x217   : > { %v843_v26 = vunpack.c.l.bf16 %v840_v22 }
 0x218   : > { %v847_v4 = vsub.f32 %v838_v11, %v844_v25  ;;  %v845_v33 = vsub.f32 %v836_v10, %v842_v24 }
 0x219   : > { %v846_v31 = vsub.f32 %v837_v12, %v843_v26 }
 0x21a   : > { %2020 = vmatmul.mubr.f32.vlgmr.msra.gmra.mrb[4].mxu1 %v847_v4 }
 0x21b   : > { %2274 = vmatpush3.bf16.msra.mxu1 %v2526_v8  ;;  %912 = vmatprep.mubr.f32.mxu0 %v846_v31 }
 0x21c   : > { %913 = vmatmul.mubr.f32.vlgmr.msra.gmra.mrb[6].mxu0 %v845_v33  ;;  %2275 = vmatprep.subr.bf16.mxu1 %v2427_v3 }
 0x21d   : > { %2243 = vmatpush3.bf16.msra.mxu0 %v2528_v9  ;;  %1052 = vmatprep.mubr.f32.mxu0 %v843_v26 }
 0x21e   : > { %2245 = vmatprep.subr.bf16.mxu0 %v2542_v14  ;;  %2054 = vmatprep.mubr.msk.f32.mxu1 %vm2428_vm0, %v2429_v13 }
 0x21f   : > { %2277 = vmatpush3.bf16.msra.mxu1 %v2555_v18 }
 0x220   : > { %2278 = vmatprep.subr.bf16.mxu1 %v2427_v3 }
 0x221   : > { %2247 = vmatpush3.bf16.msra.mxu0 %v2557_v19 }
 0x222   : > { %2249 = vmatprep.subr.bf16.mxu0 %v2570_v23 }
 0x223   : > { %2280 = vmatpush3.bf16.msra.mxu1 %v2594_v29 }
 0x224   : > { %2281 = vmatprep.subr.bf16.mxu1 %v2427_v3 }
 0x225   : > { %2251 = vmatpush3.bf16.msra.mxu0 %v2596_v30 }
 0x226   : > { %2253 = vmatprep.subr.bf16.mxu0 %v2603_v32 }
 0x227   : > { %2283 = vmatpush3.bf16.msra.mxu1 %v2623_v38 }
 0x228   : > { %2284 = vmatprep.subr.bf16.mxu1 %v2427_v3 }
 0x229   : > { %2255 = vmatpush3.bf16.msra.mxu0 %v2625_v39 }
 0x22a   : > { %2257 = vmatprep.subr.bf16.mxu0 %v2632_v41 }
 0x22b   : > { %2286 = vmatpush3.bf16.msra.mxu1 %v2654_v47 }
 0x22c   : > { %2287 = vmatprep.subr.bf16.mxu1 %v2427_v3 }
 0x22d   : > { %2259 = vmatpush3.bf16.msra.mxu0 %v2656_v48 }
 0x22e   : > { %2261 = vmatprep.subr.bf16.mxu0 %v2665_v51 }
 0x22f   : > { %2289 = vmatpush3.bf16.msra.mxu1 %v2686_v59 }
 0x230   : > { %2290 = vmatprep.subr.bf16.mxu1 %v2427_v3 }
 0x231   : > { %2263 = vmatpush3.bf16.msra.mxu0 %v2688_v60 }
 0x232   : > { %2265 = vmatprep.subr.bf16.mxu0 %v2699_v0 }
 0x233   : > { %2292 = vmatpush3.bf16.msra.mxu1 %v2723_v15  ;;  %v1576_v15 = vlaneseq }
 0x234   : > { %2293 = vmatprep.subr.bf16.mxu1 %v2427_v3 }
 0x235   : > { %2267 = vmatpush3.bf16.msra.mxu0 %v2725_v16  ;;  %v1577_v16 = vshrl.u32 %v1576_v15, 7 }
 0x236   : > { %2269 = vmatprep.subr.bf16.mxu0 %v2732_v20 }
 0x237   : > { %2295 = vmatpush3.bf16.msra.mxu1 %v2745_v27  ;;  %v1578_v20 = vsub.s32 0, %v1577_v16  ;;  %v1586_v27 = vsub.s32 2, %v1577_v16 }
 0x238   : > { %2057 = vmatprep.subr.mxu1 %v2429_v13 }
 0x239   : > { %2271 = vmatpush3.bf16.msra.mxu0 %v2747_v28  ;;  %v199_v28 = vld [vmem:[%s2974_s1] sm:$0x7] }
 0x23a   : > { %2055 = vmatmul.mubr.f32.vlgmr.msra.gmra.mrb[4].mxu1 %v844_v25  ;;  %1140 = vmatprep.subr.mxu0 %v2796_v34 }
 0x23b   : > { %2058 = vmatpush3.msra.mxu1 %v2806_v36  ;;  %2059 = vmatprep.mubr.msk.f32.mxu1 %vm2428_vm0, %v2429_v13 }
 0x23c   : > { %1053 = vmatmul.mubr.f32.vlgmr.msra.gmra.mrb[8].mxu0 %v842_v24  ;;  %2062 = vmatprep.subr.mxu1 %v2429_v13 }
 0x23d   : > { %1141 = vmatpush1.msra.mxu0 %v2801_v35  ;;  %1204 = vmatprep.mubr.f32.mxu0 %v2429_v13 }
 0x23e   : > { %1284 = vmatprep.subr.mxu0 %v2796_v34 }
 0x2ef   : > { %v1829_v3 = vpop.f32.mrb[6].mxu0 }
 0x2f0   : > { %v1830_v8 = vpop.f32.mrb[7].mxu0 }
 0x2f1   : > { %v1831_v9 = vadd.f32 %v1830_v8, %v1829_v3 }
 0x30d   : > { %v1124_v14 = vpop.f32.mrb[4].mxu1 }
 0x30e   : > { %v2056_v18 = vpop.f32.mrb[5].mxu1 }
 0x30f   : > { %v1881_v19 = vpop.f32.mrb[8].mxu0 }
 0x310   : > { %v1882_v23 = vpop.f32.mrb[9].mxu0 }
 0x311   : > { %v1883_v29 = vadd.f32 %v1882_v23, %v1881_v19 }
 0x313   : > { %v2298_v30 = vadd.f32 %v1883_v29, %v1831_v9 }
 0x315   : > { %v2299_v32 = vadd.f32 %v2298_v30, %v1124_v14 }
 0x317   : > { %v1128_v38 = vmul.f32 0.020833334, %v2299_v32 }
 0x319   : > { %v1129_v39 = vadd.f32 1e-05, %v1128_v38 }
 0x31b   : > { %2361 = vrsqrt.f32 %v1129_v39 }
 0x325   : > { %v2362_v41 = vpop.eup %2361 }
 0x326   : > { %v1131_v47 = vpack.c.bf16 %v2362_v41, %v2362_v41 }
 0x328   : > { %v1132_v48 = vunpack.c.l.bf16 %v1131_v47 }
 0x32a   : > { %v1133_v51 = vsub.f32 %v2362_v41, %v1132_v48 }
 0x32c   : > { %v1134_v59 = vpack.c.bf16 %v1133_v51, %v1133_v51 }
 0x32e   : > { %v1135_v60 = vunpack.c.l.bf16 %v1134_v59 }
 0x330   : > { %1680 = vmatmul.mubr.msk.f32.vlgmr.msra.gmra.mrb[10].mxu0 %vm544_vm1, %v1135_v60  ;;  %2060 = vmatmul.mubr.msk.f32.vlgmr.msra.gmra.mrb[6].mxu1 %vm544_vm1, %v1135_v60  ;;  %v1136_v0 = vsub.f32 %v1133_v51, %v1135_v60 }
 0x331   : > { %1285 = vmatpush1.msra.mxu0 %v2801_v35  ;;  %2063 = vmatpush3.msra.mxu1 %v2806_v36 }
 0x332   : > { %1348 = vmatprep.mubr.f32.mxu0 %v2429_v13  ;;  %2064 = vmatprep.mubr.msk.f32.mxu1 %vm2428_vm0, %v2429_v13 }
 0x333   : > { %1428 = vmatprep.subr.mxu0 %v2796_v34  ;;  %2067 = vmatprep.subr.mxu1 %v2429_v13  ;;  %v1582_v34 = vsub.s32 1, %v1577_v16 }
 0x335   : > { %v1583_v40 = vrot.slane %v199_v28, %v1582_v34 }
 0x338   : > { %1682 = vmatmul.mubr.msk.f32.vlgmr.msra.gmra.mrb[10].mxu0 %vm544_vm1, %v1132_v48  ;;  %2065 = vmatmul.mubr.msk.f32.vlgmr.msra.gmra.mrb[6].mxu1 %vm544_vm1, %v1132_v48 }
 0x339   : > { %1429 = vmatpush1.msra.mxu0 %v2801_v35  ;;  %2068 = vmatpush3.msra.mxu1 %v2806_v36  ;;  %v1579_v35 = vrot.slane %v199_v28, %v1578_v20  ;;  %v1587_v36 = vrot.slane %v199_v28, %v1586_v27 }
 0x33a   : > { %1492 = vmatprep.mubr.f32.mxu0 %v2429_v13  ;;  %2069 = vmatprep.mubr.msk.f32.mxu1 %vm2428_vm0, %v2429_v13 }
 0x340   : > { %1684 = vmatmul.mubr.msk.f32.vlgmr.msra.gmra.mrb[10].mxu0 %vm544_vm1, %v1136_v0  ;;  %2070 = vmatmul.mubr.msk.f32.vlgmr.msra.gmra.mrb[6].mxu1 %vm544_vm1, %v1136_v0 }
 0x413   : > { %v1494_v13 = vpop.f32.mrb[10].mxu0  ;;  %v1565_v37 = vpop.f32.mrb[6].mxu1 }
 0x414   : > { %v1572_v42 = vmul.f32 %v1494_v13, %v2693_v62  ;;  %v1574_v43 = vmul.f32 %v1565_v37, %v2695_v63  ;;  %v1496_v44 = vpop.f32.mrb[11].mxu0  ;;  %v2071_v45 = vpop.f32.mrb[7].mxu1 }
 0x415   : > { %v1573_v46 = vmul.f32 %v1496_v44, %v2661_v50 }
 0x416   : > { %v1591_v49 = vmul.f32 %v1579_v35, %v1572_v42  ;;  %v1593_v52 = vmul.f32 %v1587_v36, %v1574_v43 }
 0x417   : > { %v1592_v53 = vmul.f32 %v1583_v40, %v1573_v46 }
 0x418   : > { %1594 = vst [vmem:[%s190_s11] sm:$0xff] %v1591_v49  ;;  %1596 = vst [vmem:[%s190_s11 + $0x10] sm:$0xff] %v1593_v52 }
 0x419   : > { %1595 = vst [vmem:[%s190_s11 + $0x8] sm:$0xff] %v1592_v53 }
 0x41a   : > { %2376 = shalt.err (!%p2373_p3)
}
 0x41b   : > { %s2377_s22 = scalar_lea.hbm %s2931_s23, 384  ;;  %s2381_s29 = scalar_lea.hbm %s2977_s4, 768 }
 0x41c   : > { %p2378_p4 = scmp.ne.s32.totalorder %s2931_s23, %s2377_s22  ;;  %p2382_p9 = scmp.lt.u32.totalorder %s2931_s23, %s2977_s4 }
 0x41d   : > { %p2383_p10 = scmp.lt.u32.totalorder %s2381_s29, %s2377_s22  ;;  %p2385_p12 = scmp.lt.u32.totalorder %s2377_s22, %s2931_s23 }
 0x41e   : > { %p2379_p7 = pnand %p2378_p4, %p2494_p5 }
 0x41f   : > { %p2384_p11 = por %p2383_p10, %p2382_p9 }
 0x420   : > { %p2380_p8 = pneg %p2379_p7 }
 0x421   : > { %p2386_p13 = por %p2385_p12, %p2384_p11 }
 0x423   : > { %p2387_p0 = pnand %p2386_p13, %p2380_p8 }
 0x425   : > { %2390 = shalt.err (!%p2387_p0)
}
 0x426   : > { %2319 = dma.vmem_to_hbm [thread:$0]  (%p2494_p5), %s2933_s12, 384, %s2931_s23, %s1598_s19  }
 0x427 PF: > { %p2325_p1 = scmp.ge.s32.totalorder %s2425_s18, 2  ;;  %s1624_s9 = sand.u32 1, %s2413_s15  }
 0x428   : > { %s1625_s10 = scalar_lea.sflag [#allocation3], %s1624_s9 }
 0x429   : > { %p2322_p2 = pnand %p2325_p1, %p2498_p6 }
 0x42b   : > { %2408 = dma.done.wait (!%p2322_p2), %s1625_s10, 384  }
 0x42c   : > { %2410 = vsyncadd (!%p2322_p2), %s1625_s10, 4294966912  ;;  %p14_p3 = scmp.ge.s32.totalorder %s2481_s21, 4   ;;  %s2980_s15 = smov %s2417_s16 }
 0x42d   : > { %s2981_s16 = smov %s2421_s17  ;;  %s2982_s17 = smov %s2492_s24 }
 0x42e   : > { %s2983_s18 = smov %s2481_s21  ;;  %16 = sbr.rel (!%p14_p3) target bundleno = 3 (0x3), region = 71 }
 0x435   :  { %1630 = vsyncpa [#allocation3], 1 }
 0x436   :  { %1632 = vsyncpa [#allocation3 + $0x1], 1 }

</bundles_post_ra>
